<compile_context>
chip_gen: v7x
topology: tpu7x:2x2x1
jax: 0.10.0
libtpu: 0.0.40
codegen_flags: <defaults>
</compile_context>

<pallas_src>
import functools

import jax
import jax.numpy as jnp
from jax.experimental import pallas as pl
from jax.experimental.pallas import tpu as pltpu


def _round_up(x, m):
    return ((x + m - 1) // m) * m


def _pad2d(a, rows, cols):
    r, c = a.shape
    if r == rows and c == cols:
        return a
    return jnp.pad(a, ((0, rows - r), (0, cols - c)))


# ----------------------------- kernels ---------------------------------------

def _resident_kernel(x_ref, w1_ref, b1_ref, w2_ref, b2_ref, o_ref, *, compute_dtype):
    # Weights/biases stay VMEM-resident across the whole 1-D (batch-tiled) grid.
    # x_ref: (TB, D_in)  w1_ref: (D_in, Hp)  b1_ref: (1, Hp)
    # w2_ref: (Hp, Op)   b2_ref: (1, Op)     o_ref: (TB, Op)
    xc = x_ref[...].astype(compute_dtype)
    h = jnp.dot(xc, w1_ref[...], preferred_element_type=jnp.float32)
    h = jnp.maximum(h + b1_ref[...], 0.0)                      # bias + ReLU in f32
    out = jnp.dot(h.astype(compute_dtype), w2_ref[...],
                  preferred_element_type=jnp.float32)
    o_ref[...] = (out + b2_ref[...]).astype(o_ref.dtype)


def _reduction_kernel(x_ref, w1_ref, b1_ref, w2_ref, b2_ref, o_ref, acc_ref, *,
                      compute_dtype):
    # Fallback: hidden dim tiled as a trailing reduction axis (weights too big for VMEM).
    k = pl.program_id(1)

    @pl.when(k == 0)
    def _init():
        acc_ref[...] = jnp.zeros_like(acc_ref)

    xc = x_ref[...].astype(compute_dtype)
    h = jnp.dot(xc, w1_ref[...], preferred_element_type=jnp.float32)
    h = jnp.maximum(h + b1_ref[...], 0.0)
    acc_ref[...] += jnp.dot(h.astype(compute_dtype), w2_ref[...],
                            preferred_element_type=jnp.float32)

    @pl.when(k == pl.num_programs(1) - 1)
    def _finalize():
        o_ref[...] = (acc_ref[...] + b2_ref[...]).astype(o_ref.dtype)


# ----------------------------- wrapper ----------------------------------------

def expert_forward(x, w1, b1, w2, b2, *, tile_b=None, tile_h=None,
                   compute_dtype=None, max_resident_weight_bytes=16 << 20,
                   interpret=False):
    """Fused discriminator MLP: relu(x @ w1 + b1) @ w2 + b2."""
    B, D_in = x.shape
    H = w1.shape[1]
    D_out = w2.shape[1]
    assert w1.shape == (D_in, H) and w2.shape == (H, D_out)
    assert b1.shape == (H,) and b2.shape == (D_out,)

    out_dtype = x.dtype
    if compute_dtype is None:
        compute_dtype = x.dtype          # default: exact f32 parity with torch
    compute_dtype = jnp.dtype(compute_dtype)
    c_item = compute_dtype.itemsize
    x_item = jnp.dtype(x.dtype).itemsize
    o_item = jnp.dtype(out_dtype).itemsize

    d_out_p = _round_up(D_out, 128)      # lane-dense (unmasked) output stores
    h_p128 = _round_up(H, 128)

    # ---- path selection: keep weights VMEM-resident whenever they fit ------------
    resident_weight_bytes = c_item * (D_in * h_p128 + h_p128 * d_out_p)
    resident = (tile_h is None) and (resident_weight_bytes <= max_resident_weight_bytes)

    if resident:
        tile_h = h_p = h_p128
        n_h_tiles = 1
    else:
        if tile_h is None:
            tile_h = max(256, min(512, h_p128))   # >=256 keeps v5e panel DMAs efficient
        tile_h = max(128, _round_up(tile_h, 128))
        h_p = _round_up(H, tile_h)
        n_h_tiles = h_p // tile_h

    # ---- batch tiling: no batch padding, ragged last tile -------------------------
    target_rows = 2048 if resident else 512      # big tiles amortize ~0.35us/step
    if tile_b is None:
        n_tiles = pl.cdiv(B, target_rows)
        if B >= 16:
            n_tiles = max(n_tiles, 2)            # >=2 tiles so v7x's 2 TCs both engage
        tile_b = pl.cdiv(B, n_tiles)
    tile_b = max(8, _round_up(tile_b, 8))

    # ---- VMEM budget (shrink tile_b if the footprint would be too large) ----------
    def _vmem_estimate(tb):
        est = 2 * x_item * tb * D_in             # x tile, double-buffered
        est += 2 * o_item * tb * d_out_p         # out tile, double-buffered
        if resident:
            est += resident_weight_bytes + 8 * (h_p + d_out_p)   # weights + f32 biases
            est += 4 * tb * h_p                  # f32 h intermediate
        else:
            est += 3 * c_item * (D_in * tile_h + tile_h * d_out_p)  # Buffered(3) panels
            est += 8 * (tile_h + d_out_p)        # bias panels
            est += 4 * tb * tile_h               # f32 h intermediate
            est += 4 * tb * d_out_p              # f32 accumulator scratch
        return est

    budget = 40 << 20                            # conservative even for v7x (64 MiB/TC)
    while tile_b > 8 and _vmem_estimate(tile_b) > budget:
        tile_b = max(8, _round_up(tile_b // 2, 8))

    num_b_tiles = pl.cdiv(B, tile_b)             # ragged last tile: OOB writes clipped
    est = _vmem_estimate(tile_b)
    vmem_limit = int(min(max(est + est // 4, 8 << 20), 48 << 20))

    # ---- pad only the tiny weight/bias arrays (x and batch stay unpadded) ---------
    w1_p = _pad2d(w1, D_in, h_p).astype(compute_dtype)
    b1_p = _pad2d(b1.reshape(1, H), 1, h_p)                 # bias stays in input dtype
    w2_p = _pad2d(w2, h_p, d_out_p).astype(compute_dtype)
    b2_p = _pad2d(b2.reshape(1, D_out), 1, d_out_p)

    # ---- cost estimate (actual traffic) --------------------------------------------
    weight_traffic = c_item * (D_in * h_p + h_p * d_out_p)
    if not resident:
        weight_traffic *= num_b_tiles            # panels re-streamed per batch tile
    cost = pl.CostEstimate(
        flops=2 * B * (D_in * H + H * D_out),
        transcendentals=0,
        bytes_accessed=int(x_item * B * D_in + o_item * B * d_out_p
                           + weight_traffic + 8 * (h_p + d_out_p)),
    )

    # ---- specs / grid ---------------------------------------------------------------
    if resident:
        grid = (num_b_tiles,)
        kernel = functools.partial(_resident_kernel, compute_dtype=compute_dtype)
        in_specs = [
            pl.BlockSpec((tile_b, D_in), lambda i: (i, 0)),      # x streams (unpadded)
            pl.BlockSpec((D_in, h_p), lambda i: (0, 0)),         # w1 resident
            pl.BlockSpec((1, h_p), lambda i: (0, 0)),            # b1 resident
            pl.BlockSpec((h_p, d_out_p), lambda i: (0, 0)),      # w2 resident
            pl.BlockSpec((1, d_out_p), lambda i: (0, 0)),        # b2 resident
        ]
        out_spec = pl.BlockSpec((tile_b, d_out_p), lambda i: (i, 0))
        scratch = []
        dims = ("parallel",)
    else:
        grid = (num_b_tiles, n_h_tiles)                          # reduction axis last
        kernel = functools.partial(_reduction_kernel, compute_dtype=compute_dtype)
        in_specs = [
            pl.BlockSpec((tile_b, D_in), lambda i, k: (i, 0)),   # x resident across k
            pl.BlockSpec((D_in, tile_h), lambda i, k: (0, k),
                         pipeline_mode=pl.Buffered(3)),          # w1 panel, 3-deep
            pl.BlockSpec((1, tile_h), lambda i, k: (0, k)),      # b1 panel
            pl.BlockSpec((tile_h, d_out_p), lambda i, k: (k, 0),
                         pipeline_mode=pl.Buffered(3)),          # w2 panel, 3-deep
            pl.BlockSpec((1, d_out_p), lambda i, k: (0, 0)),     # b2
        ]
        out_spec = pl.BlockSpec((tile_b, d_out_p), lambda i, k: (i, 0))
        scratch = [pltpu.VMEM((tile_b, d_out_p), jnp.float32)]
        dims = ("parallel", "arbitrary")

    out_p = pl.pallas_call(
        kernel,
        out_shape=jax.ShapeDtypeStruct((B, d_out_p), out_dtype),
        grid_spec=pltpu.PrefetchScalarGridSpec(
            num_scalar_prefetch=0,
            grid=grid,
            in_specs=in_specs,
            out_specs=out_spec,
            scratch_shapes=scratch,
        ),
        compiler_params=pltpu.CompilerParams(
            dimension_semantics=dims,
            vmem_limit_bytes=vmem_limit,
        ),
        cost_estimate=cost,
        interpret=interpret,
    )(x, w1_p, b1_p, w2_p, b2_p)

    return out_p[:, :D_out] if d_out_p != D_out else out_p


# ----------------------------- helpers / tests --------------------------------

def init_linear(key, in_features, out_features, dtype=jnp.float32):
    """torch.nn.Linear-style init (uniform +/- 1/sqrt(fan_in)); weight pre-transposed
    to (in_features, out_features)."""
    kw, kb = jax.random.split(key)
    bound = 1.0 / jnp.sqrt(jnp.float32(in_features))
    w = jax.random.uniform(kw, (in_features, out_features), dtype, -bound, bound)
    b = jax.random.uniform(kb, (out_features,), dtype, -bound, bound)
    return w, b


def _reference(x, w1, b1, w2, b2):
    return jnp.maximum(x @ w1 + b1, 0.0) @ w2 + b2


if __name__ == "__main__":
    key = jax.random.PRNGKey(0)

    # Case 1: tiny shapes consistent with the module: Expert(32, 32, 16), batch=8.
    batch, input_dim, hidden_dim, output_dim = 8, 32, 32, 16
    kx, k1, k2, key = jax.random.split(key, 4)
    x = jax.random.normal(kx, (batch, input_dim), jnp.float32)
    w1, b1 = init_linear(k1, input_dim, hidden_dim)   # discriminator[0]
    w2, b2 = init_linear(k2, hidden_dim, output_dim)  # discriminator[2]

    out = jax.block_until_ready(expert_forward(x, w1, b1, w2, b2))
    ref = _reference(x, w1, b1, w2, b2)
    assert out.shape == (batch, output_dim)
    assert jnp.allclose(out, ref, atol=5e-4, rtol=5e-4), "mismatch (small, resident)"

    # Case 2: larger batch, multi-tile resident path (weights fetched once).
    batch2, input_dim2, hidden_dim2, output_dim2 = 1056, 96, 320, 48
    kx2, k12, k22, key = jax.random.split(key, 4)
    x2 = jax.random.normal(kx2, (batch2, input_dim2), jnp.float32)
    w1b, b1b = init_linear(k12, input_dim2, hidden_dim2)
    w2b, b2b = init_linear(k22, hidden_dim2, output_dim2)

    out2 = jax.block_until_ready(expert_forward(x2, w1b, b1b, w2b, b2b))
    ref2 = _reference(x2, w1b, b1b, w2b, b2b)
    assert out2.shape == (batch2, output_dim2)
    assert jnp.allclose(out2, ref2, atol=5e-4, rtol=5e-4), "mismatch (resident, tiled B)"

    # Case 3: force the H-reduction fallback path (accumulator + Buffered weight panels).
    out3 = jax.block_until_ready(
        expert_forward(x2, w1b, b1b, w2b, b2b, tile_b=352, tile_h=128))
    assert out3.shape == (batch2, output_dim2)
    assert jnp.allclose(out3, ref2, atol=5e-4, rtol=5e-4), "mismatch (reduction path)"

    # Case 4: optional bf16 MXU path (f32 accumulation), loose tolerance.
    out4 = jax.block_until_ready(
        expert_forward(x2, w1b, b1b, w2b, b2b, compute_dtype=jnp.bfloat16))
    assert out4.shape == (batch2, output_dim2)
    assert jnp.allclose(out4, ref2, atol=5e-2, rtol=5e-2), "mismatch (bf16 path)"

    print("KERNEL_OK")
</pallas_src>

<mosaic_0001>
module attributes {stable_mosaic.version = 11 : i64} {
  func.func @_resident_kernel(%arg0: i32, %arg1: memref<8x32xf32, #tpu.memory_space<vmem>>, %arg2: memref<32x128xf32, #tpu.memory_space<vmem>>, %arg3: memref<1x128xf32, #tpu.memory_space<vmem>>, %arg4: memref<128x128xf32, #tpu.memory_space<vmem>>, %arg5: memref<1x128xf32, #tpu.memory_space<vmem>>, %arg6: memref<8x128xf32, #tpu.memory_space<vmem>>) attributes {dimension_semantics = [#tpu.dimension_semantics<parallel>], iteration_bounds = array<i64: 1>, scalar_prefetch = 0 : i64, scratch_operands = 0 : i64, tpu.core_type = #tpu.core_type<tc>, window_params = [{transform_indices = @transform_0, window_bounds = array<i64: 8, 32>}, {pipeline_mode = #tpu.pipeline_mode<synchronous>, transform_indices = @transform_1, window_bounds = array<i64: 32, 128>}, {pipeline_mode = #tpu.pipeline_mode<synchronous>, transform_indices = @transform_2, window_bounds = array<i64: 1, 128>}, {pipeline_mode = #tpu.pipeline_mode<synchronous>, transform_indices = @transform_3, window_bounds = array<i64: 128, 128>}, {pipeline_mode = #tpu.pipeline_mode<synchronous>, transform_indices = @transform_4, window_bounds = array<i64: 1, 128>}, {transform_indices = @transform_5, window_bounds = array<i64: 8, 128>}]} {
    %c0 = arith.constant 0 : index
    %c0_0 = arith.constant 0 : index
    %0 = vector.load %arg1[%c0, %c0_0] : memref<8x32xf32, #tpu.memory_space<vmem>>, vector<8x32xf32>
    %c0_1 = arith.constant 0 : index
    %c0_2 = arith.constant 0 : index
    %1 = vector.load %arg2[%c0_1, %c0_2] : memref<32x128xf32, #tpu.memory_space<vmem>>, vector<32x128xf32>
    %cst = arith.constant dense<0.000000e+00> : vector<8x128xf32>
    %2 = tpu.matmul %0, %1, %cst {dimension_numbers = #tpu.dot_dimension_numbers<[1], [0], [0], [1], [0, 0, 1, 1], [], []>} : vector<8x32xf32>, vector<32x128xf32>, vector<8x128xf32> -> vector<8x128xf32>
    %c0_3 = arith.constant 0 : index
    %c0_4 = arith.constant 0 : index
    %3 = vector.load %arg3[%c0_3, %c0_4] : memref<1x128xf32, #tpu.memory_space<vmem>>, vector<1x128xf32>
    %4 = vector.broadcast %3 : vector<1x128xf32> to vector<8x128xf32>
    %5 = arith.addf %2, %4 : vector<8x128xf32>
    %cst_5 = arith.constant 0.000000e+00 : f32
    %6 = vector.broadcast %cst_5 : f32 to vector<8x128xf32>
    %7 = arith.maximumf %5, %6 : vector<8x128xf32>
    %c0_6 = arith.constant 0 : index
    %c0_7 = arith.constant 0 : index
    %8 = vector.load %arg4[%c0_6, %c0_7] : memref<128x128xf32, #tpu.memory_space<vmem>>, vector<128x128xf32>
    %cst_8 = arith.constant dense<0.000000e+00> : vector<8x128xf32>
    %9 = tpu.matmul %7, %8, %cst_8 {dimension_numbers = #tpu.dot_dimension_numbers<[1], [0], [0], [1], [0, 0, 1, 1], [], []>} : vector<8x128xf32>, vector<128x128xf32>, vector<8x128xf32> -> vector<8x128xf32>
    %c0_9 = arith.constant 0 : index
    %c0_10 = arith.constant 0 : index
    %10 = vector.load %arg5[%c0_9, %c0_10] : memref<1x128xf32, #tpu.memory_space<vmem>>, vector<1x128xf32>
    %11 = vector.broadcast %10 : vector<1x128xf32> to vector<8x128xf32>
    %12 = arith.addf %9, %11 : vector<8x128xf32>
    %c0_11 = arith.constant 0 : index
    %c0_12 = arith.constant 0 : index
    %13 = vector.load %arg6[%c0_11, %c0_12] : memref<8x128xf32, #tpu.memory_space<vmem>>, vector<8x128xf32>
    tpu.vector_store %arg6[%c0_11, %c0_12], %12 {strides = array<i32>} : memref<8x128xf32, #tpu.memory_space<vmem>>, vector<8x128xf32>,
    return
  }
  func.func @transform_0(%arg0: i32) -> (i32, i32) {
    %c0_i32 = arith.constant 0 : i32
    %c0_i32_0 = arith.constant 0 : i32
    return %arg0, %c0_i32 : i32, i32
  }
  func.func @transform_1(%arg0: i32) -> (i32, i32) {
    %c0_i32 = arith.constant 0 : i32
    %c0_i32_0 = arith.constant 0 : i32
    %c0_i32_1 = arith.constant 0 : i32
    return %c0_i32, %c0_i32_0 : i32, i32
  }
  func.func @transform_2(%arg0: i32) -> (i32, i32) {
    %c0_i32 = arith.constant 0 : i32
    %c0_i32_0 = arith.constant 0 : i32
    %c0_i32_1 = arith.constant 0 : i32
    return %c0_i32, %c0_i32_0 : i32, i32
  }
  func.func @transform_3(%arg0: i32) -> (i32, i32) {
    %c0_i32 = arith.constant 0 : i32
    %c0_i32_0 = arith.constant 0 : i32
    %c0_i32_1 = arith.constant 0 : i32
    return %c0_i32, %c0_i32_0 : i32, i32
  }
  func.func @transform_4(%arg0: i32) -> (i32, i32) {
    %c0_i32 = arith.constant 0 : i32
    %c0_i32_0 = arith.constant 0 : i32
    %c0_i32_1 = arith.constant 0 : i32
    return %c0_i32, %c0_i32_0 : i32, i32
  }
  func.func @transform_5(%arg0: i32) -> (i32, i32) {
    %c0_i32 = arith.constant 0 : i32
    %c0_i32_0 = arith.constant 0 : i32
    return %arg0, %c0_i32 : i32, i32
  }
}

</mosaic_0001>

<bundles_post_ra>
// kernel: tpu_custom_call.1
= control target key start
LH: loop header
LB: loop body
LE: loop exit
PB: predicated region body
PF: predicated region fallthrough
CT: control target
= control target key end

     0   :  { %10 = vsyncpa [#allocation3], 0  ;;  %s560_s0 = inlined_call_operand.hbm [shape: f32[8,32], index: 0, kind: input, shape index: {}]   ;;  %s561_s1 = inlined_call_operand.hbm [shape: f32[32,128], index: 1, kind: input, shape index: {}]   ;;  %s562_s2 = inlined_call_operand.vmem [shape: f32[1,128], index: 2, kind: input, shape index: {}]   ;;  %s563_s3 = inlined_call_operand.hbm [shape: f32[128,128], index: 3, kind: input, shape index: {}]   ;;  %s564_s4 = inlined_call_operand.vmem [shape: f32[1,128], index: 4, kind: input, shape index: {}]   ;;  %s565_s5 = inlined_call_operand.hbm [shape: f32[8,128], index: 5, kind: output, shape index: {}]  }
   0x1   :  { %11 = vsyncpa [#allocation6], 0 }
   0x2   :  { %12 = vsyncpa [#allocation4], 0  ;;  %s461_s18 = smov [#allocation5]   ;;  %s367_s22 = scalar_lea.hbm %s561_s1, 512 }
   0x3   :  { %s28_s19 = sshll.u32 %s461_s18, 4  ;;  %p368_p0 = scmp.ne.s32.totalorder %s561_s1, %s367_s22  ;;  %s29_s19 = int_to_ptr.vmem [resolvable:$true] %s28_s19 }
   0x4   :  { %p371_p1 = scmp.lt.u32.totalorder %s367_s22, %s561_s1 }
   0x6   :  { %p373_p2 = pnand %p371_p1, %p368_p0 }
   0x8   :  { %376 = shalt.err (!%p373_p2)
}
   0x9   :  { %s377_s27 = scalar_lea.vmem %s29_s19, 512  ;;  %p382_p4 = scmp.lt.s32.totalorder %s29_s19, %s29_s19 }
   0xa   :  { %p378_p3 = scmp.ne.s32.totalorder %s29_s19, %s377_s27  ;;  %p383_p5 = scmp.lt.s32.totalorder %s377_s27, %s377_s27 }
   0xc   :  { %p384_p6 = por %p383_p5, %p382_p4 }
   0xe   :  { %p385_p7 = pnand %p384_p6, %p378_p3 }
  0x10   :  { %388 = shalt.err (!%p385_p7)
}
  0x11   :  { %s462_s28 = smov 128   ;;  %s463_s29 = smov 8  }
  0x12   :  { %34 = dma.hbm_to_vmem [thread:$0]  %s561_s1, 512, %s29_s19, [#allocation6], %s462_s28, %s462_s28, %s463_s29  }
  0x13   :  { %s464_s7 = smov [#allocation2]   ;;  %s465_s9 = smov [#allocation7]  }
  0x14   :  { %s19_s8 = sshll.u32 %s464_s7, 4  ;;  %s42_s10 = sshll.u32 %s465_s9, 4  ;;  %s20_s8 = int_to_ptr.vmem [resolvable:$true] %s19_s8  ;;  %s43_s10 = int_to_ptr.vmem [resolvable:$true] %s42_s10 }
  0x15   :  { %s389_s13 = scalar_lea.hbm %s560_s0, 128 }
  0x16   :  { %p390_p8 = scmp.ne.s32.totalorder %s560_s0, %s389_s13  ;;  %p393_p9 = scmp.lt.u32.totalorder %s389_s13, %s560_s0 }
  0x18   :  { %p395_p10 = pnand %p393_p9, %p390_p8 }
  0x1a   :  { %398 = shalt.err (!%p395_p10)
}
  0x1b   :  { %s399_s1 = scalar_lea.vmem %s20_s8, 128  ;;  %p404_p12 = scmp.lt.s32.totalorder %s20_s8, %s20_s8 }
  0x1c   :  { %p400_p11 = scmp.ne.s32.totalorder %s20_s8, %s399_s1  ;;  %p405_p13 = scmp.lt.s32.totalorder %s399_s1, %s399_s1 }
  0x1e   :  { %p406_p0 = por %p405_p13, %p404_p12 }
  0x20   :  { %p407_p1 = pnand %p406_p0, %p400_p11 }
  0x22   :  { %410 = shalt.err (!%p407_p1)
}
  0x23   :  { %22 = dma.hbm_to_vmem [thread:$0]  %s560_s0, 128, %s20_s8, [#allocation3]  }
  0x24   :  { %s411_s22 = scalar_lea.hbm %s563_s3, 2048 }
  0x25   :  { %p412_p2 = scmp.ne.s32.totalorder %s563_s3, %s411_s22  ;;  %p415_p3 = scmp.lt.u32.totalorder %s411_s22, %s563_s3 }
  0x27   :  { %p417_p4 = pnand %p415_p3, %p412_p2 }
  0x29   :  { %420 = shalt.err (!%p417_p4)
}
  0x2a   :  { %s421_s27 = scalar_lea.vmem %s43_s10, 2048  ;;  %p426_p6 = scmp.lt.s32.totalorder %s43_s10, %s43_s10 }
  0x2b   :  { %p422_p5 = scmp.ne.s32.totalorder %s43_s10, %s421_s27  ;;  %p427_p7 = scmp.lt.s32.totalorder %s421_s27, %s421_s27 }
  0x2d   :  { %p428_p8 = por %p427_p7, %p426_p6 }
  0x2f   :  { %p429_p9 = pnand %p428_p8, %p422_p5 }
  0x31   :  { %432 = shalt.err (!%p429_p9)
}
  0x32   :  { %48 = dma.hbm_to_vmem [thread:$0]  %s563_s3, 2048, %s43_s10, [#allocation6], %s462_s28, %s462_s28, %s463_s29  }
  0x33   :  { %455 = dma.done.wait [#allocation3], 128  }
  0x34   :  { %456 = vsyncadd [#allocation3], 4294967168 }
  0x35   :  { %457 = dma.done.wait [#allocation6], 2560  }
  0x36   :  { %458 = vsyncadd [#allocation6], 4294964736  ;;  %v466_v0 = vmov 0.0|0.0   ;;  %vm467_vm0 = vmmov 0   ;;  %v468_v1 = vmov 0.0   ;;  %v61_v2 = vld [vmem:[#allocation5] sm:$0xff] }
  0x37   :  { %328 = vmatprep.subr.bf16.mxu0 %v466_v0  ;;  %290 = vmatprep.mubr.msk.f32.mxu0 %vm467_vm0, %v468_v1  ;;  %v62_v3 = vld [vmem:[#allocation5 + $0x8] sm:$0xff]  ;;  %v63_v4 = vld [vmem:[#allocation5 + $0x10] sm:$0xff]  ;;  %v64_v6 = vld [vmem:[#allocation5 + $0x18] sm:$0xff]  ;;  %vm72_vm1 = vcmask 261120   ;;  %s469_s7 = smov [#allocation8]  }
  0x38   :  { %334 = vmatprep.subr.bf16.mxu1 %v466_v0  ;;  %325 = vmatprep.mubr.msk.f32.mxu1 %vm467_vm0, %v468_v1  ;;  %v329_v5 = vpack.c.bf16 %v62_v3, %v61_v2  ;;  %v147_v7 = vld [vmem:[#allocation7] sm:$0xff]  ;;  %v148_v8 = vld [vmem:[#allocation7 + $0x8] sm:$0xff]  ;;  %v149_v9 = vld [vmem:[#allocation7 + $0x10] sm:$0xff]  ;;  %v332_v11 = vpack.c.bf16 %v64_v6, %v63_v4  ;;  %s247_s8 = sshll.u32 %s469_s7, 4  ;;  %s248_s8 = int_to_ptr.vmem [resolvable:$true] %s247_s8 }
  0x39   :  { %v150_v10 = vld [vmem:[#allocation7 + $0x18] sm:$0xff]  ;;  %v335_v12 = vpack.c.bf16 %v148_v8, %v147_v7  ;;  %v151_v14 = vld [vmem:[#allocation7 + $0x20] sm:$0xff]  ;;  %v152_v15 = vld [vmem:[#allocation7 + $0x28] sm:$0xff]  ;;  %s433_s9 = scalar_lea.vmem %s248_s8, 128  ;;  %p438_p11 = scmp.lt.s32.totalorder %s248_s8, %s248_s8 }
  0x3a   :  { %330 = vmatpush3.bf16.msra.mxu0 %v329_v5  ;;  %v338_v13 = vpack.c.bf16 %v150_v10, %v149_v9  ;;  %v60_v16 = vld [vmem:[#allocation2] sm:$0xff]  ;;  %v341_v17 = vpack.c.bf16 %v152_v15, %v151_v14  ;;  %v153_v18 = vld [vmem:[#allocation7 + $0x30] sm:$0xff]  ;;  %v155_v21 = vld [vmem:[#allocation7 + $0x40] sm:$0xff]  ;;  %p434_p10 = scmp.ne.s32.totalorder %s248_s8, %s433_s9  ;;  %p439_p12 = scmp.lt.s32.totalorder %s433_s9, %s433_s9 }
  0x3b   :  { %331 = vmatprep.subr.bf16.mxu0 %v466_v0  ;;  %336 = vmatpush3.bf16.msra.mxu1 %v335_v12  ;;  %v154_v19 = vld [vmem:[#allocation7 + $0x38] sm:$0xff]  ;;  %v156_v22 = vld [vmem:[#allocation7 + $0x48] sm:$0xff]  ;;  %v157_v24 = vld [vmem:[#allocation7 + $0x50] sm:$0xff] }
  0x3c   :  { %337 = vmatprep.subr.bf16.mxu1 %v466_v0  ;;  %v344_v20 = vpack.c.bf16 %v154_v19, %v153_v18  ;;  %v347_v23 = vpack.c.bf16 %v156_v22, %v155_v21  ;;  %v158_v25 = vld [vmem:[#allocation7 + $0x58] sm:$0xff]  ;;  %v159_v27 = vld [vmem:[#allocation7 + $0x60] sm:$0xff]  ;;  %v160_v28 = vld [vmem:[#allocation7 + $0x68] sm:$0xff]  ;;  %p440_p13 = por %p439_p12, %p438_p11 }
  0x3d   :  { %v350_v26 = vpack.c.bf16 %v158_v25, %v157_v24  ;;  %v353_v29 = vpack.c.bf16 %v160_v28, %v159_v27  ;;  %v161_v30 = vld [vmem:[#allocation7 + $0x70] sm:$0xff]  ;;  %v162_v31 = vld [vmem:[#allocation7 + $0x78] sm:$0xff] }
  0x3e   :  { %333 = vmatpush3.bf16.msra.mxu0 %v332_v11  ;;  %v356_v32 = vpack.c.bf16 %v162_v31, %v161_v30  ;;  %v257_v33 = vld [vmem:[%s562_s2] ss:$0 sm:$0xff]  ;;  %p441_p0 = pnand %p440_p13, %p434_p10 }
  0x3f   :  { %339 = vmatpush3.bf16.msra.mxu1 %v338_v13  ;;  %v259_v38 = vld [vmem:[%s564_s4] ss:$0 sm:$0xff] }
  0x40   :  { %340 = vmatprep.subr.bf16.mxu1 %v466_v0 }
  0x41   :  { %291 = vmatmul.mubr.msk.f32.vlgmr.msra.gmra.mrb[0].mxu0 %vm72_vm1, %v60_v16 }
  0x43   :  { %342 = vmatpush3.bf16.msra.mxu1 %v341_v17 }
  0x44   :  { %343 = vmatprep.subr.bf16.mxu1 %v466_v0 }
  0x47   :  { %345 = vmatpush3.bf16.msra.mxu1 %v344_v20 }
  0x48   :  { %346 = vmatprep.subr.bf16.mxu1 %v466_v0 }
  0x4b   :  { %348 = vmatpush3.bf16.msra.mxu1 %v347_v23 }
  0x4c   :  { %349 = vmatprep.subr.bf16.mxu1 %v466_v0 }
  0x4f   :  { %351 = vmatpush3.bf16.msra.mxu1 %v350_v26 }
  0x50   :  { %352 = vmatprep.subr.bf16.mxu1 %v466_v0 }
  0x53   :  { %354 = vmatpush3.bf16.msra.mxu1 %v353_v29 }
  0x54   :  { %355 = vmatprep.subr.bf16.mxu1 %v466_v0 }
  0x57   :  { %357 = vmatpush3.bf16.msra.mxu1 %v356_v32 }
 0x114   :  { %v142_v34 = vpop.f32.mrb[0].mxu0 }
 0x115   :  { %v143_v35 = vadd.f32 %v257_v33, %v142_v34  ;;  %v292_v36 = vpop.f32.mrb[1].mxu0 }
 0x117   :  { %v146_v37 = vmax.f32 %v143_v35, 0.0 }
 0x119   :  { %326 = vmatmul.mubr.f32.vlgmr.msra.gmra.mrb[0].mxu1 %v146_v37 }
 0x1ec   :  { %v236_v39 = vpop.f32.mrb[0].mxu1 }
 0x1ed   :  { %v237_v40 = vadd.f32 %v259_v38, %v236_v39  ;;  %v327_v41 = vpop.f32.mrb[1].mxu1 }
 0x1ef   :  { %240 = vst [vmem:[#allocation8] sm:$0xff] %v237_v40 }
 0x1f0   :  { %444 = shalt.err (!%p441_p0)
}
 0x1f1   :  { %s445_s11 = scalar_lea.hbm %s565_s5, 128 }
 0x1f2   :  { %p446_p1 = scmp.ne.s32.totalorder %s565_s5, %s445_s11  ;;  %p449_p2 = scmp.lt.u32.totalorder %s445_s11, %s565_s5 }
 0x1f4   :  { %p451_p3 = pnand %p449_p2, %p446_p1 }
 0x1f6   :  { %454 = shalt.err (!%p451_p3)
}
 0x1f7   :  { %250 = dma.vmem_to_hbm [thread:$0]  %s248_s8, 128, %s565_s5, [#allocation4]  }
 0x1f8   :  { %459 = dma.done.wait [#allocation4], 128  }
 0x1f9   :  { %460 = vsyncadd [#allocation4], 4294967168 }
 0x1fa   :  { %254 = vsyncpa [#allocation3], 1 }
 0x1fb   :  { %255 = vsyncpa [#allocation6], 1 }
 0x1fc   :  { %256 = vsyncpa [#allocation4], 1 }

</bundles_post_ra>
